<compile_context>
chip_gen: v7x
topology: tpu7x:2x2x1
jax: 0.10.0
libtpu: 0.0.40
codegen_flags: <defaults>
</compile_context>

<pallas_src>
import functools

import jax
import jax.numpy as jnp
from jax.experimental import pallas as pl
from jax.experimental.pallas import tpu as pltpu


def _detector_kernel(x_ref, h0_ref, c0_ref, wih_ref, whh_ref, b_ref,
                     wout_ref, bout_ref, pred_ref, hT_ref, cT_ref, hs_ref,
                     *, seq_len, batch, hidden_size):
    """Whole LSTM recurrence + Linear head in one invocation (no grid)."""
    T, B, H = seq_len, batch, hidden_size

    # Hoisted input projection + fused bias: one MXU pass, off the serial chain.
    xw = jnp.dot(x_ref[...], wih_ref[...],
                 preferred_element_type=jnp.float32) + b_ref[...]      # (T*B, 4H)

    whh = whh_ref[...]                                                 # (H, 4H)
    h = h0_ref[...]                                                    # (B, H) f32
    c = c0_ref[...]                                                    # (B, H) f32

    # Static unroll over time: the h-recurrence is the only serial dependency.
    for t in range(T):
        gates = xw[t * B:(t + 1) * B, :] + jnp.dot(
            h, whh, preferred_element_type=jnp.float32)                # (B, 4H)
        # PyTorch gate order [i, f, g, o]: sigmoid on i/f/o, tanh on g.
        sig = jax.nn.sigmoid(gates)
        i_g = sig[:, 0 * H:1 * H]
        f_g = sig[:, 1 * H:2 * H]
        o_g = sig[:, 3 * H:4 * H]
        g_g = jnp.tanh(gates[:, 2 * H:3 * H])
        c = f_g * c + i_g * g_g
        h = o_g * jnp.tanh(c)
        hs_ref[t * B:(t + 1) * B, :] = h                               # static slice store

    # Batched output head: one (T*B, H) x (H, F) matmul + bias, one writeback.
    pred = jnp.dot(hs_ref[...], wout_ref[...],
                   preferred_element_type=jnp.float32) + bout_ref[...]
    pred_ref[...] = pred.astype(pred_ref.dtype)
    hT_ref[...] = h.astype(hT_ref.dtype)
    cT_ref[...] = c.astype(cT_ref.dtype)


def detector_forward(seq, h0, c0, params):
    """seq: (T, B, F) f32;  h0/c0: (1, B, H) f32.  Returns (pred, (hT, cT))."""
    T, B, F = seq.shape
    H = params["w_hh"].shape[1]          # w_hh has shape (4H, H)

    kernel = functools.partial(_detector_kernel,
                               seq_len=T, batch=B, hidden_size=H)

    vmem = lambda: pl.BlockSpec(memory_space=pltpu.MemorySpace.VMEM)

    pred_flat, hT, cT = pl.pallas_call(
        kernel,
        in_specs=[vmem() for _ in range(8)],
        out_specs=(vmem(), vmem(), vmem()),
        out_shape=(
            jax.ShapeDtypeStruct((T * B, F), jnp.float32),   # pred, flattened (T*B, F)
            jax.ShapeDtypeStruct((B, H), jnp.float32),       # h_T
            jax.ShapeDtypeStruct((B, H), jnp.float32),       # c_T
        ),
        scratch_shapes=[pltpu.VMEM((T * B, H), jnp.float32)],  # per-step hidden states
    )(
        seq.reshape(T * B, F),                       # x, flattened in the wrapper
        h0[0], c0[0],
        params["w_ih"].T,                            # (F, 4H)
        params["w_hh"].T,                            # (H, 4H)
        (params["b_ih"] + params["b_hh"])[None, :],  # fused bias (1, 4H)
        params["w_out"].T,                           # (H, F)
        params["b_out"][None, :],                    # (1, F)
    )
    return pred_flat.reshape(T, B, F), (hT[None], cT[None])


def _reference_forward(seq, h0, c0, params):
    """Pure-JAX reference (lax.scan LSTM) for correctness checking."""
    wih_t = params["w_ih"].T
    whh_t = params["w_hh"].T
    b = params["b_ih"] + params["b_hh"]
    wout_t = params["w_out"].T
    bout = params["b_out"]
    H = params["w_hh"].shape[1]
    hp = jax.lax.Precision.HIGHEST

    def step(carry, xt):
        h, c = carry
        gates = (jnp.dot(xt, wih_t, precision=hp)
                 + jnp.dot(h, whh_t, precision=hp) + b)
        i_g = jax.nn.sigmoid(gates[:, 0 * H:1 * H])
        f_g = jax.nn.sigmoid(gates[:, 1 * H:2 * H])
        g_g = jnp.tanh(gates[:, 2 * H:3 * H])
        o_g = jax.nn.sigmoid(gates[:, 3 * H:4 * H])
        c = f_g * c + i_g * g_g
        h = o_g * jnp.tanh(c)
        return (h, c), jnp.dot(h, wout_t, precision=hp) + bout

    (hT, cT), preds = jax.lax.scan(step, (h0[0], c0[0]), seq)
    return preds, (hT[None], cT[None])


if __name__ == "__main__":
    INPUT_SIZE = 52   # Nfeatures
    HIDDEN = 64
    T = 8             # sequence length
    B = 2             # batch

    key = jax.random.PRNGKey(0)
    ks = jax.random.split(key, 8)
    bound = 1.0 / (HIDDEN ** 0.5)   # PyTorch-style uniform init range

    params = {
        "w_ih": jax.random.uniform(ks[0], (4 * HIDDEN, INPUT_SIZE), jnp.float32, -bound, bound),
        "w_hh": jax.random.uniform(ks[1], (4 * HIDDEN, HIDDEN), jnp.float32, -bound, bound),
        "b_ih": jax.random.uniform(ks[2], (4 * HIDDEN,), jnp.float32, -bound, bound),
        "b_hh": jax.random.uniform(ks[3], (4 * HIDDEN,), jnp.float32, -bound, bound),
        "w_out": jax.random.uniform(ks[4], (INPUT_SIZE, HIDDEN), jnp.float32, -bound, bound),
        "b_out": jax.random.uniform(ks[5], (INPUT_SIZE,), jnp.float32, -bound, bound),
    }

    seq = jax.random.normal(ks[6], (T, B, INPUT_SIZE), jnp.float32)
    h0 = jnp.zeros((1, B, HIDDEN), jnp.float32)   # init_state, as in _get_RE
    c0 = jnp.zeros((1, B, HIDDEN), jnp.float32)

    pred, (hT, cT) = detector_forward(seq, h0, c0, params)
    jax.block_until_ready((pred, hT, cT))

    ref_pred, (ref_hT, ref_cT) = _reference_forward(seq, h0, c0, params)
    assert pred.shape == (T, B, INPUT_SIZE)
    assert hT.shape == (1, B, HIDDEN) and cT.shape == (1, B, HIDDEN)
    assert jnp.allclose(pred, ref_pred, atol=2e-4, rtol=2e-4)
    assert jnp.allclose(hT, ref_hT, atol=2e-4, rtol=2e-4)
    assert jnp.allclose(cT, ref_cT, atol=2e-4, rtol=2e-4)

    print("KERNEL_OK")
</pallas_src>

<mosaic_0001>
module attributes {stable_mosaic.version = 11 : i64} {
  func.func @_detector_kernel(%arg0: memref<16x52xf32, #tpu.memory_space<vmem>>, %arg1: memref<2x64xf32, #tpu.memory_space<vmem>>, %arg2: memref<2x64xf32, #tpu.memory_space<vmem>>, %arg3: memref<52x256xf32, #tpu.memory_space<vmem>>, %arg4: memref<64x256xf32, #tpu.memory_space<vmem>>, %arg5: memref<1x256xf32, #tpu.memory_space<vmem>>, %arg6: memref<64x52xf32, #tpu.memory_space<vmem>>, %arg7: memref<1x52xf32, #tpu.memory_space<vmem>>, %arg8: memref<16x52xf32, #tpu.memory_space<vmem>>, %arg9: memref<2x64xf32, #tpu.memory_space<vmem>>, %arg10: memref<2x64xf32, #tpu.memory_space<vmem>>, %arg11: memref<16x64xf32, #tpu.memory_space<vmem>>) attributes {dimension_semantics = [], scalar_prefetch = 0 : i64, scratch_operands = 1 : i64, tpu.core_type = #tpu.core_type<tc>} {
    %c0 = arith.constant 0 : index
    %c0_0 = arith.constant 0 : index
    %0 = vector.load %arg0[%c0, %c0_0] : memref<16x52xf32, #tpu.memory_space<vmem>>, vector<16x52xf32>
    %c0_1 = arith.constant 0 : index
    %c0_2 = arith.constant 0 : index
    %1 = vector.load %arg3[%c0_1, %c0_2] : memref<52x256xf32, #tpu.memory_space<vmem>>, vector<52x256xf32>
    %cst = arith.constant dense<0.000000e+00> : vector<16x256xf32>
    %2 = tpu.matmul %0, %1, %cst {dimension_numbers = #tpu.dot_dimension_numbers<[1], [0], [0], [1], [0, 0, 1, 1], [], []>} : vector<16x52xf32>, vector<52x256xf32>, vector<16x256xf32> -> vector<16x256xf32>
    %c0_3 = arith.constant 0 : index
    %c0_4 = arith.constant 0 : index
    %3 = vector.load %arg5[%c0_3, %c0_4] : memref<1x256xf32, #tpu.memory_space<vmem>>, vector<1x256xf32>
    %4 = vector.broadcast %3 : vector<1x256xf32> to vector<16x256xf32>
    %5 = arith.addf %2, %4 : vector<16x256xf32>
    %c0_5 = arith.constant 0 : index
    %c0_6 = arith.constant 0 : index
    %6 = vector.load %arg4[%c0_5, %c0_6] : memref<64x256xf32, #tpu.memory_space<vmem>>, vector<64x256xf32>
    %c0_7 = arith.constant 0 : index
    %c0_8 = arith.constant 0 : index
    %7 = vector.load %arg1[%c0_7, %c0_8] : memref<2x64xf32, #tpu.memory_space<vmem>>, vector<2x64xf32>
    %c0_9 = arith.constant 0 : index
    %c0_10 = arith.constant 0 : index
    %8 = vector.load %arg2[%c0_9, %c0_10] : memref<2x64xf32, #tpu.memory_space<vmem>>, vector<2x64xf32>
    %9 = vector.extract_strided_slice %5 {offsets = [0, 0], sizes = [2, 256], strides = [1, 1]} : vector<16x256xf32> to vector<2x256xf32>
    %cst_11 = arith.constant dense<0.000000e+00> : vector<2x256xf32>
    %10 = tpu.matmul %7, %6, %cst_11 {dimension_numbers = #tpu.dot_dimension_numbers<[1], [0], [0], [1], [0, 0, 1, 1], [], []>} : vector<2x64xf32>, vector<64x256xf32>, vector<2x256xf32> -> vector<2x256xf32>
    %11 = arith.addf %9, %10 : vector<2x256xf32>
    %12 = arith.negf %11 : vector<2x256xf32>
    %13 = math.exp %12 : vector<2x256xf32>
    %cst_12 = arith.constant 1.000000e+00 : f32
    %14 = vector.broadcast %cst_12 : f32 to vector<2x256xf32>
    %15 = arith.addf %14, %13 : vector<2x256xf32>
    %16 = arith.divf %14, %15 : vector<2x256xf32>
    %17 = vector.extract_strided_slice %16 {offsets = [0, 0], sizes = [2, 64], strides = [1, 1]} : vector<2x256xf32> to vector<2x64xf32>
    %18 = vector.extract_strided_slice %16 {offsets = [0, 64], sizes = [2, 64], strides = [1, 1]} : vector<2x256xf32> to vector<2x64xf32>
    %19 = vector.extract_strided_slice %16 {offsets = [0, 192], sizes = [2, 64], strides = [1, 1]} : vector<2x256xf32> to vector<2x64xf32>
    %20 = vector.extract_strided_slice %11 {offsets = [0, 128], sizes = [2, 64], strides = [1, 1]} : vector<2x256xf32> to vector<2x64xf32>
    %21 = math.tanh %20 : vector<2x64xf32>
    %22 = arith.mulf %18, %8 : vector<2x64xf32>
    %23 = arith.mulf %17, %21 : vector<2x64xf32>
    %24 = arith.addf %22, %23 : vector<2x64xf32>
    %25 = math.tanh %24 : vector<2x64xf32>
    %26 = arith.mulf %19, %25 : vector<2x64xf32>
    %c0_13 = arith.constant 0 : index
    %c0_14 = arith.constant 0 : index
    %27 = vector.load %arg11[%c0_13, %c0_14] : memref<16x64xf32, #tpu.memory_space<vmem>>, vector<2x64xf32>
    tpu.vector_store %arg11[%c0_13, %c0_14], %26 {strides = array<i32>} : memref<16x64xf32, #tpu.memory_space<vmem>>, vector<2x64xf32>,
    %28 = vector.extract_strided_slice %5 {offsets = [2, 0], sizes = [2, 256], strides = [1, 1]} : vector<16x256xf32> to vector<2x256xf32>
    %cst_15 = arith.constant dense<0.000000e+00> : vector<2x256xf32>
    %29 = tpu.matmul %26, %6, %cst_15 {dimension_numbers = #tpu.dot_dimension_numbers<[1], [0], [0], [1], [0, 0, 1, 1], [], []>} : vector<2x64xf32>, vector<64x256xf32>, vector<2x256xf32> -> vector<2x256xf32>
    %30 = arith.addf %28, %29 : vector<2x256xf32>
    %31 = arith.negf %30 : vector<2x256xf32>
    %32 = math.exp %31 : vector<2x256xf32>
    %cst_16 = arith.constant 1.000000e+00 : f32
    %33 = vector.broadcast %cst_16 : f32 to vector<2x256xf32>
    %34 = arith.addf %33, %32 : vector<2x256xf32>
    %35 = arith.divf %33, %34 : vector<2x256xf32>
    %36 = vector.extract_strided_slice %35 {offsets = [0, 0], sizes = [2, 64], strides = [1, 1]} : vector<2x256xf32> to vector<2x64xf32>
    %37 = vector.extract_strided_slice %35 {offsets = [0, 64], sizes = [2, 64], strides = [1, 1]} : vector<2x256xf32> to vector<2x64xf32>
    %38 = vector.extract_strided_slice %35 {offsets = [0, 192], sizes = [2, 64], strides = [1, 1]} : vector<2x256xf32> to vector<2x64xf32>
    %39 = vector.extract_strided_slice %30 {offsets = [0, 128], sizes = [2, 64], strides = [1, 1]} : vector<2x256xf32> to vector<2x64xf32>
    %40 = math.tanh %39 : vector<2x64xf32>
    %41 = arith.mulf %37, %24 : vector<2x64xf32>
    %42 = arith.mulf %36, %40 : vector<2x64xf32>
    %43 = arith.addf %41, %42 : vector<2x64xf32>
    %44 = math.tanh %43 : vector<2x64xf32>
    %45 = arith.mulf %38, %44 : vector<2x64xf32>
    %c2 = arith.constant 2 : index
    %c0_17 = arith.constant 0 : index
    %46 = vector.load %arg11[%c2, %c0_17] : memref<16x64xf32, #tpu.memory_space<vmem>>, vector<2x64xf32>
    tpu.vector_store %arg11[%c2, %c0_17], %45 {strides = array<i32>} : memref<16x64xf32, #tpu.memory_space<vmem>>, vector<2x64xf32>,
    %47 = vector.extract_strided_slice %5 {offsets = [4, 0], sizes = [2, 256], strides = [1, 1]} : vector<16x256xf32> to vector<2x256xf32>
    %cst_18 = arith.constant dense<0.000000e+00> : vector<2x256xf32>
    %48 = tpu.matmul %45, %6, %cst_18 {dimension_numbers = #tpu.dot_dimension_numbers<[1], [0], [0], [1], [0, 0, 1, 1], [], []>} : vector<2x64xf32>, vector<64x256xf32>, vector<2x256xf32> -> vector<2x256xf32>
    %49 = arith.addf %47, %48 : vector<2x256xf32>
    %50 = arith.negf %49 : vector<2x256xf32>
    %51 = math.exp %50 : vector<2x256xf32>
    %cst_19 = arith.constant 1.000000e+00 : f32
    %52 = vector.broadcast %cst_19 : f32 to vector<2x256xf32>
    %53 = arith.addf %52, %51 : vector<2x256xf32>
    %54 = arith.divf %52, %53 : vector<2x256xf32>
    %55 = vector.extract_strided_slice %54 {offsets = [0, 0], sizes = [2, 64], strides = [1, 1]} : vector<2x256xf32> to vector<2x64xf32>
    %56 = vector.extract_strided_slice %54 {offsets = [0, 64], sizes = [2, 64], strides = [1, 1]} : vector<2x256xf32> to vector<2x64xf32>
    %57 = vector.extract_strided_slice %54 {offsets = [0, 192], sizes = [2, 64], strides = [1, 1]} : vector<2x256xf32> to vector<2x64xf32>
    %58 = vector.extract_strided_slice %49 {offsets = [0, 128], sizes = [2, 64], strides = [1, 1]} : vector<2x256xf32> to vector<2x64xf32>
    %59 = math.tanh %58 : vector<2x64xf32>
    %60 = arith.mulf %56, %43 : vector<2x64xf32>
    %61 = arith.mulf %55, %59 : vector<2x64xf32>
    %62 = arith.addf %60, %61 : vector<2x64xf32>
    %63 = math.tanh %62 : vector<2x64xf32>
    %64 = arith.mulf %57, %63 : vector<2x64xf32>
    %c4 = arith.constant 4 : index
    %c0_20 = arith.constant 0 : index
    %65 = vector.load %arg11[%c4, %c0_20] : memref<16x64xf32, #tpu.memory_space<vmem>>, vector<2x64xf32>
    tpu.vector_store %arg11[%c4, %c0_20], %64 {strides = array<i32>} : memref<16x64xf32, #tpu.memory_space<vmem>>, vector<2x64xf32>,
    %66 = vector.extract_strided_slice %5 {offsets = [6, 0], sizes = [2, 256], strides = [1, 1]} : vector<16x256xf32> to vector<2x256xf32>
    %cst_21 = arith.constant dense<0.000000e+00> : vector<2x256xf32>
    %67 = tpu.matmul %64, %6, %cst_21 {dimension_numbers = #tpu.dot_dimension_numbers<[1], [0], [0], [1], [0, 0, 1, 1], [], []>} : vector<2x64xf32>, vector<64x256xf32>, vector<2x256xf32> -> vector<2x256xf32>
    %68 = arith.addf %66, %67 : vector<2x256xf32>
    %69 = arith.negf %68 : vector<2x256xf32>
    %70 = math.exp %69 : vector<2x256xf32>
    %cst_22 = arith.constant 1.000000e+00 : f32
    %71 = vector.broadcast %cst_22 : f32 to vector<2x256xf32>
    %72 = arith.addf %71, %70 : vector<2x256xf32>
    %73 = arith.divf %71, %72 : vector<2x256xf32>
    %74 = vector.extract_strided_slice %73 {offsets = [0, 0], sizes = [2, 64], strides = [1, 1]} : vector<2x256xf32> to vector<2x64xf32>
    %75 = vector.extract_strided_slice %73 {offsets = [0, 64], sizes = [2, 64], strides = [1, 1]} : vector<2x256xf32> to vector<2x64xf32>
    %76 = vector.extract_strided_slice %73 {offsets = [0, 192], sizes = [2, 64], strides = [1, 1]} : vector<2x256xf32> to vector<2x64xf32>
    %77 = vector.extract_strided_slice %68 {offsets = [0, 128], sizes = [2, 64], strides = [1, 1]} : vector<2x256xf32> to vector<2x64xf32>
    %78 = math.tanh %77 : vector<2x64xf32>
    %79 = arith.mulf %75, %62 : vector<2x64xf32>
    %80 = arith.mulf %74, %78 : vector<2x64xf32>
    %81 = arith.addf %79, %80 : vector<2x64xf32>
    %82 = math.tanh %81 : vector<2x64xf32>
    %83 = arith.mulf %76, %82 : vector<2x64xf32>
    %c6 = arith.constant 6 : index
    %c0_23 = arith.constant 0 : index
    %84 = vector.load %arg11[%c6, %c0_23] : memref<16x64xf32, #tpu.memory_space<vmem>>, vector<2x64xf32>
    tpu.vector_store %arg11[%c6, %c0_23], %83 {strides = array<i32>} : memref<16x64xf32, #tpu.memory_space<vmem>>, vector<2x64xf32>,
    %85 = vector.extract_strided_slice %5 {offsets = [8, 0], sizes = [2, 256], strides = [1, 1]} : vector<16x256xf32> to vector<2x256xf32>
    %cst_24 = arith.constant dense<0.000000e+00> : vector<2x256xf32>
    %86 = tpu.matmul %83, %6, %cst_24 {dimension_numbers = #tpu.dot_dimension_numbers<[1], [0], [0], [1], [0, 0, 1, 1], [], []>} : vector<2x64xf32>, vector<64x256xf32>, vector<2x256xf32> -> vector<2x256xf32>
    %87 = arith.addf %85, %86 : vector<2x256xf32>
    %88 = arith.negf %87 : vector<2x256xf32>
    %89 = math.exp %88 : vector<2x256xf32>
    %cst_25 = arith.constant 1.000000e+00 : f32
    %90 = vector.broadcast %cst_25 : f32 to vector<2x256xf32>
    %91 = arith.addf %90, %89 : vector<2x256xf32>
    %92 = arith.divf %90, %91 : vector<2x256xf32>
    %93 = vector.extract_strided_slice %92 {offsets = [0, 0], sizes = [2, 64], strides = [1, 1]} : vector<2x256xf32> to vector<2x64xf32>
    %94 = vector.extract_strided_slice %92 {offsets = [0, 64], sizes = [2, 64], strides = [1, 1]} : vector<2x256xf32> to vector<2x64xf32>
    %95 = vector.extract_strided_slice %92 {offsets = [0, 192], sizes = [2, 64], strides = [1, 1]} : vector<2x256xf32> to vector<2x64xf32>
    %96 = vector.extract_strided_slice %87 {offsets = [0, 128], sizes = [2, 64], strides = [1, 1]} : vector<2x256xf32> to vector<2x64xf32>
    %97 = math.tanh %96 : vector<2x64xf32>
    %98 = arith.mulf %94, %81 : vector<2x64xf32>
    %99 = arith.mulf %93, %97 : vector<2x64xf32>
    %100 = arith.addf %98, %99 : vector<2x64xf32>
    %101 = math.tanh %100 : vector<2x64xf32>
    %102 = arith.mulf %95, %101 : vector<2x64xf32>
    %c8 = arith.constant 8 : index
    %c0_26 = arith.constant 0 : index
    %103 = vector.load %arg11[%c8, %c0_26] : memref<16x64xf32, #tpu.memory_space<vmem>>, vector<2x64xf32>
    tpu.vector_store %arg11[%c8, %c0_26], %102 {strides = array<i32>} : memref<16x64xf32, #tpu.memory_space<vmem>>, vector<2x64xf32>,
    %104 = vector.extract_strided_slice %5 {offsets = [10, 0], sizes = [2, 256], strides = [1, 1]} : vector<16x256xf32> to vector<2x256xf32>
    %cst_27 = arith.constant dense<0.000000e+00> : vector<2x256xf32>
    %105 = tpu.matmul %102, %6, %cst_27 {dimension_numbers = #tpu.dot_dimension_numbers<[1], [0], [0], [1], [0, 0, 1, 1], [], []>} : vector<2x64xf32>, vector<64x256xf32>, vector<2x256xf32> -> vector<2x256xf32>
    %106 = arith.addf %104, %105 : vector<2x256xf32>
    %107 = arith.negf %106 : vector<2x256xf32>
    %108 = math.exp %107 : vector<2x256xf32>
    %cst_28 = arith.constant 1.000000e+00 : f32
    %109 = vector.broadcast %cst_28 : f32 to vector<2x256xf32>
    %110 = arith.addf %109, %108 : vector<2x256xf32>
    %111 = arith.divf %109, %110 : vector<2x256xf32>
    %112 = vector.extract_strided_slice %111 {offsets = [0, 0], sizes = [2, 64], strides = [1, 1]} : vector<2x256xf32> to vector<2x64xf32>
    %113 = vector.extract_strided_slice %111 {offsets = [0, 64], sizes = [2, 64], strides = [1, 1]} : vector<2x256xf32> to vector<2x64xf32>
    %114 = vector.extract_strided_slice %111 {offsets = [0, 192], sizes = [2, 64], strides = [1, 1]} : vector<2x256xf32> to vector<2x64xf32>
    %115 = vector.extract_strided_slice %106 {offsets = [0, 128], sizes = [2, 64], strides = [1, 1]} : vector<2x256xf32> to vector<2x64xf32>
    %116 = math.tanh %115 : vector<2x64xf32>
    %117 = arith.mulf %113, %100 : vector<2x64xf32>
    %118 = arith.mulf %112, %116 : vector<2x64xf32>
    %119 = arith.addf %117, %118 : vector<2x64xf32>
    %120 = math.tanh %119 : vector<2x64xf32>
    %121 = arith.mulf %114, %120 : vector<2x64xf32>
    %c10 = arith.constant 10 : index
    %c0_29 = arith.constant 0 : index
    %122 = vector.load %arg11[%c10, %c0_29] : memref<16x64xf32, #tpu.memory_space<vmem>>, vector<2x64xf32>
    tpu.vector_store %arg11[%c10, %c0_29], %121 {strides = array<i32>} : memref<16x64xf32, #tpu.memory_space<vmem>>, vector<2x64xf32>,
    %123 = vector.extract_strided_slice %5 {offsets = [12, 0], sizes = [2, 256], strides = [1, 1]} : vector<16x256xf32> to vector<2x256xf32>
    %cst_30 = arith.constant dense<0.000000e+00> : vector<2x256xf32>
    %124 = tpu.matmul %121, %6, %cst_30 {dimension_numbers = #tpu.dot_dimension_numbers<[1], [0], [0], [1], [0, 0, 1, 1], [], []>} : vector<2x64xf32>, vector<64x256xf32>, vector<2x256xf32> -> vector<2x256xf32>
    %125 = arith.addf %123, %124 : vector<2x256xf32>
    %126 = arith.negf %125 : vector<2x256xf32>
    %127 = math.exp %126 : vector<2x256xf32>
    %cst_31 = arith.constant 1.000000e+00 : f32
    %128 = vector.broadcast %cst_31 : f32 to vector<2x256xf32>
    %129 = arith.addf %128, %127 : vector<2x256xf32>
    %130 = arith.divf %128, %129 : vector<2x256xf32>
    %131 = vector.extract_strided_slice %130 {offsets = [0, 0], sizes = [2, 64], strides = [1, 1]} : vector<2x256xf32> to vector<2x64xf32>
    %132 = vector.extract_strided_slice %130 {offsets = [0, 64], sizes = [2, 64], strides = [1, 1]} : vector<2x256xf32> to vector<2x64xf32>
    %133 = vector.extract_strided_slice %130 {offsets = [0, 192], sizes = [2, 64], strides = [1, 1]} : vector<2x256xf32> to vector<2x64xf32>
    %134 = vector.extract_strided_slice %125 {offsets = [0, 128], sizes = [2, 64], strides = [1, 1]} : vector<2x256xf32> to vector<2x64xf32>
    %135 = math.tanh %134 : vector<2x64xf32>
    %136 = arith.mulf %132, %119 : vector<2x64xf32>
    %137 = arith.mulf %131, %135 : vector<2x64xf32>
    %138 = arith.addf %136, %137 : vector<2x64xf32>
    %139 = math.tanh %138 : vector<2x64xf32>
    %140 = arith.mulf %133, %139 : vector<2x64xf32>
    %c12 = arith.constant 12 : index
    %c0_32 = arith.constant 0 : index
    %141 = vector.load %arg11[%c12, %c0_32] : memref<16x64xf32, #tpu.memory_space<vmem>>, vector<2x64xf32>
    tpu.vector_store %arg11[%c12, %c0_32], %140 {strides = array<i32>} : memref<16x64xf32, #tpu.memory_space<vmem>>, vector<2x64xf32>,
    %142 = vector.extract_strided_slice %5 {offsets = [14, 0], sizes = [2, 256], strides = [1, 1]} : vector<16x256xf32> to vector<2x256xf32>
    %cst_33 = arith.constant dense<0.000000e+00> : vector<2x256xf32>
    %143 = tpu.matmul %140, %6, %cst_33 {dimension_numbers = #tpu.dot_dimension_numbers<[1], [0], [0], [1], [0, 0, 1, 1], [], []>} : vector<2x64xf32>, vector<64x256xf32>, vector<2x256xf32> -> vector<2x256xf32>
    %144 = arith.addf %142, %143 : vector<2x256xf32>
    %145 = arith.negf %144 : vector<2x256xf32>
    %146 = math.exp %145 : vector<2x256xf32>
    %cst_34 = arith.constant 1.000000e+00 : f32
    %147 = vector.broadcast %cst_34 : f32 to vector<2x256xf32>
    %148 = arith.addf %147, %146 : vector<2x256xf32>
    %149 = arith.divf %147, %148 : vector<2x256xf32>
    %150 = vector.extract_strided_slice %149 {offsets = [0, 0], sizes = [2, 64], strides = [1, 1]} : vector<2x256xf32> to vector<2x64xf32>
    %151 = vector.extract_strided_slice %149 {offsets = [0, 64], sizes = [2, 64], strides = [1, 1]} : vector<2x256xf32> to vector<2x64xf32>
    %152 = vector.extract_strided_slice %149 {offsets = [0, 192], sizes = [2, 64], strides = [1, 1]} : vector<2x256xf32> to vector<2x64xf32>
    %153 = vector.extract_strided_slice %144 {offsets = [0, 128], sizes = [2, 64], strides = [1, 1]} : vector<2x256xf32> to vector<2x64xf32>
    %154 = math.tanh %153 : vector<2x64xf32>
    %155 = arith.mulf %151, %138 : vector<2x64xf32>
    %156 = arith.mulf %150, %154 : vector<2x64xf32>
    %157 = arith.addf %155, %156 : vector<2x64xf32>
    %158 = math.tanh %157 : vector<2x64xf32>
    %159 = arith.mulf %152, %158 : vector<2x64xf32>
    %c14 = arith.constant 14 : index
    %c0_35 = arith.constant 0 : index
    %160 = vector.load %arg11[%c14, %c0_35] : memref<16x64xf32, #tpu.memory_space<vmem>>, vector<2x64xf32>
    tpu.vector_store %arg11[%c14, %c0_35], %159 {strides = array<i32>} : memref<16x64xf32, #tpu.memory_space<vmem>>, vector<2x64xf32>,
    %c0_36 = arith.constant 0 : index
    %c0_37 = arith.constant 0 : index
    %161 = vector.load %arg11[%c0_36, %c0_37] : memref<16x64xf32, #tpu.memory_space<vmem>>, vector<16x64xf32>
    %c0_38 = arith.constant 0 : index
    %c0_39 = arith.constant 0 : index
    %162 = vector.load %arg6[%c0_38, %c0_39] : memref<64x52xf32, #tpu.memory_space<vmem>>, vector<64x52xf32>
    %cst_40 = arith.constant dense<0.000000e+00> : vector<16x52xf32>
    %163 = tpu.matmul %161, %162, %cst_40 {dimension_numbers = #tpu.dot_dimension_numbers<[1], [0], [0], [1], [0, 0, 1, 1], [], []>} : vector<16x64xf32>, vector<64x52xf32>, vector<16x52xf32> -> vector<16x52xf32>
    %c0_41 = arith.constant 0 : index
    %c0_42 = arith.constant 0 : index
    %164 = vector.load %arg7[%c0_41, %c0_42] : memref<1x52xf32, #tpu.memory_space<vmem>>, vector<1x52xf32>
    %165 = vector.broadcast %164 : vector<1x52xf32> to vector<16x52xf32>
    %166 = arith.addf %163, %165 : vector<16x52xf32>
    %c0_43 = arith.constant 0 : index
    %c0_44 = arith.constant 0 : index
    %167 = vector.load %arg8[%c0_43, %c0_44] : memref<16x52xf32, #tpu.memory_space<vmem>>, vector<16x52xf32>
    tpu.vector_store %arg8[%c0_43, %c0_44], %166 {strides = array<i32>} : memref<16x52xf32, #tpu.memory_space<vmem>>, vector<16x52xf32>,
    %c0_45 = arith.constant 0 : index
    %c0_46 = arith.constant 0 : index
    %168 = vector.load %arg9[%c0_45, %c0_46] : memref<2x64xf32, #tpu.memory_space<vmem>>, vector<2x64xf32>
    tpu.vector_store %arg9[%c0_45, %c0_46], %159 {strides = array<i32>} : memref<2x64xf32, #tpu.memory_space<vmem>>, vector<2x64xf32>,
    %c0_47 = arith.constant 0 : index
    %c0_48 = arith.constant 0 : index
    %169 = vector.load %arg10[%c0_47, %c0_48] : memref<2x64xf32, #tpu.memory_space<vmem>>, vector<2x64xf32>
    tpu.vector_store %arg10[%c0_47, %c0_48], %157 {strides = array<i32>} : memref<2x64xf32, #tpu.memory_space<vmem>>, vector<2x64xf32>,
    return
  }
}

</mosaic_0001>

<bundles_post_ra>
// kernel: tpu_custom_call.1
= control target key start
LH: loop header
LB: loop body
LE: loop exit
PB: predicated region body
PF: predicated region fallthrough
CT: control target
= control target key end

     0   :  { %16 = vsyncpa [#allocation4], 0  ;;  %s2096_s0 = inlined_call_operand.hbm [shape: f32[16,52], index: 0, kind: input, shape index: {}]   ;;  %s2097_s1 = inlined_call_operand.vmem [shape: f32[2,64], index: 1, kind: input, shape index: {}]   ;;  %s2098_s2 = inlined_call_operand.vmem [shape: f32[2,64], index: 2, kind: input, shape index: {}]   ;;  %s2099_s3 = inlined_call_operand.hbm [shape: f32[52,256], index: 3, kind: input, shape index: {}]   ;;  %s2100_s4 = inlined_call_operand.vmem [shape: f32[64,256], index: 4, kind: input, shape index: {}]   ;;  %s2101_s5 = inlined_call_operand.vmem [shape: f32[1,256], index: 5, kind: input, shape index: {}]   ;;  %s2102_s6 = inlined_call_operand.vmem [shape: f32[64,52], index: 6, kind: input, shape index: {}]   ;;  %s2103_s7 = inlined_call_operand.vmem [shape: f32[1,52], index: 7, kind: input, shape index: {}]   ;;  %s2104_s8 = inlined_call_operand.hbm [shape: f32[16,52], index: 8, kind: output, shape index: {0}]   ;;  %s2105_s9 = inlined_call_operand.hbm [shape: f32[2,64], index: 9, kind: output, shape index: {1}]   ;;  %s2106_s10 = inlined_call_operand.hbm [shape: f32[2,64], index: 10, kind: output, shape index: {2}]  }
   0x1   :  { %17 = vsyncpa [#allocation7], 0 }
   0x2   :  { %18 = vsyncpa [#allocation5], 0 }
   0x3   :  { %19 = vsyncpa [#allocation10], 0  ;;  %s1689_s13 = smov [#allocation3]   ;;  %s1571_s17 = scalar_lea.hbm %s2096_s0, 256 }
   0x4   :  { %s25_s14 = sshll.u32 %s1689_s13, 4  ;;  %p1572_p0 = scmp.ne.s32.totalorder %s2096_s0, %s1571_s17  ;;  %s26_s14 = int_to_ptr.vmem [resolvable:$true] %s25_s14 }
   0x5   :  { %p1575_p1 = scmp.lt.u32.totalorder %s1571_s17, %s2096_s0 }
   0x7   :  { %p1577_p2 = pnand %p1575_p1, %p1572_p0 }
   0x9   :  { %1580 = shalt.err (!%p1577_p2)
}
   0xa   :  { %s1581_s22 = scalar_lea.vmem %s26_s14, 256  ;;  %p1586_p4 = scmp.lt.s32.totalorder %s26_s14, %s26_s14 }
   0xb   :  { %p1582_p3 = scmp.ne.s32.totalorder %s26_s14, %s1581_s22  ;;  %p1587_p5 = scmp.lt.s32.totalorder %s1581_s22, %s1581_s22 }
   0xd   :  { %p1588_p6 = por %p1587_p5, %p1586_p4 }
   0xf   :  { %p1589_p7 = pnand %p1588_p6, %p1582_p3 }
  0x11   :  { %1592 = shalt.err (!%p1589_p7)
}
  0x12   :  { %s1690_s23 = smov 128   ;;  %s1691_s24 = smov 8  }
  0x13   :  { %31 = dma.hbm_to_vmem [thread:$0]  %s2096_s0, 256, %s26_s14, [#allocation4], %s1690_s23, %s1690_s23, %s1691_s24  }
  0x14   :  { %s1692_s27 = smov [#allocation6]   ;;  %s1593_s11 = scalar_lea.hbm %s2099_s3, 1792 }
  0x15   :  { %s41_s28 = sshll.u32 %s1692_s27, 4  ;;  %p1594_p8 = scmp.ne.s32.totalorder %s2099_s3, %s1593_s11  ;;  %s42_s28 = int_to_ptr.vmem [resolvable:$true] %s41_s28 }
  0x16   :  { %p1597_p9 = scmp.lt.u32.totalorder %s1593_s11, %s2099_s3 }
  0x18   :  { %p1599_p10 = pnand %p1597_p9, %p1594_p8 }
  0x1a   :  { %1602 = shalt.err (!%p1599_p10)
}
  0x1b   :  { %s1603_s17 = scalar_lea.vmem %s42_s28, 1792  ;;  %p1608_p12 = scmp.lt.s32.totalorder %s42_s28, %s42_s28 }
  0x1c   :  { %p1604_p11 = scmp.ne.s32.totalorder %s42_s28, %s1603_s17  ;;  %p1609_p13 = scmp.lt.s32.totalorder %s1603_s17, %s1603_s17 }
  0x1e   :  { %p1610_p0 = por %p1609_p13, %p1608_p12 }
  0x20   :  { %p1611_p1 = pnand %p1610_p0, %p1604_p11 }
  0x22   :  { %1614 = shalt.err (!%p1611_p1)
}
  0x23   :  { %s1693_s0 = smov 256   ;;  %s1694_s14 = smov 16  }
  0x24   :  { %47 = dma.hbm_to_vmem [thread:$0]  %s2099_s3, 1792, %s42_s28, [#allocation7], %s1693_s0, %s1693_s0, %s1694_s14  }
  0x25   :  { %1681 = dma.done.wait [#allocation4], 256  }
  0x26   :  { %1682 = vsyncadd [#allocation4], 4294967040 }
  0x27   :  { %1683 = dma.done.wait [#allocation7], 1792  }
  0x28   :  { %1684 = vsyncadd [#allocation7], 4294965504  ;;  %v1695_v0 = vmov 0.0   ;;  %v65_v1 = vld [vmem:[#allocation6 + $0x8] sm:$0xff]  ;;  %v67_v2 = vld [vmem:[#allocation6 + $0x18] sm:$0xff]  ;;  %vm97_vm0 = vcmask 1043456   ;;  %v80_v48 = vlaneseq }
  0x29   :  { %168 = vmatprep.mubr.f32.mxu0 %v1695_v0  ;;  %267 = vmatprep.mubr.f32.mxu1 %v1695_v0  ;;  %v182_v3 = vld [vmem:[%s2100_s4 + $0x8] sm:$0xff]  ;;  %v1308_v4 = vpack.c.bf16 %v67_v2, %v65_v1  ;;  %v184_v5 = vld [vmem:[%s2100_s4 + $0x18] sm:$0xff]  ;;  %v64_v6 = vld [vmem:[#allocation6] sm:$0xff]  ;;  %s1696_s16 = smov 64   ;;  %vm90_vm1 = vcmask 424960   ;;  %vm199_vm2 = vcmask 523264  }
  0x2a   :  { %v66_v7 = vld [vmem:[#allocation6 + $0x10] sm:$0xff]  ;;  %v1790_v8 = vpack.c.bf16 %v184_v5, %v182_v3  ;;  %v181_v10 = vld [vmem:[%s2100_s4] sm:$0xff]  ;;  %v69_v12 = vld [vmem:[#allocation6 + $0x28] sm:$0xff]  ;;  %v81_v49 = vshrl.u32 %v80_v48, 7  ;;  %vm306_vm3 = vcmask 517120   ;;  %vm418_vm4 = vcmask 519170  }
  0x2b   :  { %v1310_v9 = vpack.c.bf16 %v66_v7, %v64_v6  ;;  %v183_v11 = vld [vmem:[%s2100_s4 + $0x10] sm:$0xff]  ;;  %1309 = vmatprep.subr.bf16.mxu0 %v1308_v4  ;;  %v71_v14 = vld [vmem:[#allocation6 + $0x38] sm:$0xff]  ;;  %v186_v15 = vld [vmem:[%s2100_s4 + $0x28] sm:$0xff]  ;;  %vm648_vm5 = vcmask 523270   ;;  %vm533_vm6 = vcmask 521220  }
  0x2c   :  { %v1798_v13 = vpack.c.bf16 %v183_v11, %v181_v10  ;;  %v188_v16 = vld [vmem:[%s2100_s4 + $0x38] sm:$0xff]  ;;  %1321 = vmatprep.subr.bf16.mxu1 %v1790_v8  ;;  %v1312_v17 = vpack.c.bf16 %v71_v14, %v69_v12  ;;  %v68_v19 = vld [vmem:[#allocation6 + $0x20] sm:$0xff]  ;;  %v70_v20 = vld [vmem:[#allocation6 + $0x30] sm:$0xff]  ;;  %v82_v50 = vsub.s32 0, %v81_v49  ;;  %v86_v57 = vsub.s32 1, %v81_v49 }
  0x2d   :  { %1311 = vmatpush1.bf16.msra.mxu0 %v1310_v9  ;;  %v1807_v18 = vpack.c.bf16 %v188_v16, %v186_v15  ;;  %v185_v21 = vld [vmem:[%s2100_s4 + $0x20] sm:$0xff]  ;;  %v1314_v22 = vpack.c.bf16 %v70_v20, %v68_v19  ;;  %v187_v23 = vld [vmem:[%s2100_s4 + $0x30] sm:$0xff]  ;;  %v73_v24 = vld [vmem:[#allocation6 + $0x48] sm:$0xff] }
  0x2e   :  { %1323 = vmatpush1.bf16.msra.mxu1 %v1798_v13  ;;  %v75_v25 = vld [vmem:[#allocation6 + $0x58] sm:$0xff]  ;;  %1313 = vmatprep.subr.bf16.mxu0 %v1312_v17  ;;  %v1817_v26 = vpack.c.bf16 %v187_v23, %v185_v21  ;;  %v190_v28 = vld [vmem:[%s2100_s4 + $0x48] sm:$0xff]  ;;  %v72_v30 = vld [vmem:[#allocation6 + $0x40] sm:$0xff] }
  0x2f   :  { %1325 = vmatprep.subr.bf16.mxu1 %v1807_v18  ;;  %v1316_v27 = vpack.c.bf16 %v75_v25, %v73_v24  ;;  %v192_v29 = vld [vmem:[%s2100_s4 + $0x58] sm:$0xff]  ;;  %v74_v32 = vld [vmem:[#allocation6 + $0x50] sm:$0xff]  ;;  %v189_v33 = vld [vmem:[%s2100_s4 + $0x40] sm:$0xff] }
  0x30   :  { %v1825_v31 = vpack.c.bf16 %v192_v29, %v190_v28  ;;  %v191_v34 = vld [vmem:[%s2100_s4 + $0x50] sm:$0xff]  ;;  %v1318_v35 = vpack.c.bf16 %v74_v32, %v72_v30  ;;  %v194_v36 = vld [vmem:[%s2100_s4 + $0x68] sm:$0xff]  ;;  %v196_v37 = vld [vmem:[%s2100_s4 + $0x78] sm:$0xff] }
  0x31   :  { %1315 = vmatpush1.bf16.msra.mxu0 %v1314_v22  ;;  %v1840_v38 = vpack.c.bf16 %v191_v34, %v189_v33  ;;  %v77_v39 = vld [vmem:[#allocation6 + $0x68] sm:$0xf]  ;;  %v1843_v40 = vpack.c.bf16 %v196_v37, %v194_v36  ;;  %v193_v41 = vld [vmem:[%s2100_s4 + $0x60] sm:$0xff]  ;;  %v195_v42 = vld [vmem:[%s2100_s4 + $0x70] sm:$0xff] }
  0x32   :  { %1327 = vmatpush1.bf16.msra.mxu1 %v1817_v26  ;;  %1317 = vmatprep.subr.bf16.mxu0 %v1316_v27  ;;  %v198_v43 = vld [vmem:[%s2098_s2] sm:$0x3]  ;;  %v1856_v45 = vpack.c.bf16 %v195_v42, %v193_v41  ;;  %v62_v46 = vld [vmem:[#allocation3] sm:$0xff]  ;;  %v63_v6 = vld [vmem:[#allocation3 + $0x8] sm:$0xff] }
  0x33   :  { %1329 = vmatprep.subr.bf16.mxu1 %v1825_v31  ;;  %290 = vrot.lane.b32.xlu0 %v198_v43, %s1696_s16  ;;  %v76_v44 = vld [vmem:[#allocation6 + $0x60] sm:$0xf] }
  0x34   :  { %v197_v47 = vld [vmem:[%s2097_s1] sm:$0x3] }
  0x35   :  { %1319 = vmatpush1.bf16.msra.mxu0 %v1318_v35  ;;  %v78_v51 = vld [vmem:[%s2101_s5] sm:$0x3] }
  0x36   :  { %1331 = vmatpush1.bf16.msra.mxu1 %v1840_v38  ;;  %1248 = vmatprep.subr.msk.mxu0 %vm97_vm0, %v77_v39  ;;  %v1888_v52 = vrot.slane %v78_v51, %v82_v50  ;;  %v1894_v61 = vrot.slane %v78_v51, %v86_v57 }
  0x37   :  { %1333 = vmatprep.subr.bf16.mxu1 %v1843_v40 }
  0x39   :  { %1249 = vmatpush1.msk.msra.mxu0 %vm97_vm0, %v76_v44 }
  0x3a   :  { %1335 = vmatpush1.bf16.msra.mxu1 %v1856_v45  ;;  %1250 = vmatmul.mubr.msk.f32.vlgmr.msra.gmra.mrb[0].mxu0 %vm90_vm1, %v62_v46 }
  0x3b   :  { %1337 = vmatprep.subr.bf16.mxu0 %v1790_v8  ;;  %174 = vmatprep.mubr.f32.mxu0 %v1695_v0 }
  0x3c   :  { %1339 = vmatpush1.bf16.msra.mxu0 %v1798_v13  ;;  %1353 = vmatprep.subr.bf16.mxu1 %v1790_v8 }
  0x3d   :  { %1252 = vmatmul.mubr.msk.f32.vlgmr.msra.gmra.mrb[0].mxu1 %vm199_vm2, %v197_v47  ;;  %1341 = vmatprep.subr.bf16.mxu0 %v1807_v18 }
  0x3e   :  { %1355 = vmatpush1.bf16.msra.mxu1 %v1798_v13  ;;  %489 = vmatprep.mubr.f32.mxu1 %v1695_v0 }
  0x3f   :  { %1357 = vmatprep.subr.bf16.mxu1 %v1807_v18  ;;  %1251 = vmatmul.mubr.msk.f32.gmra.mrb[2].mxu0 %vm90_vm1, %v63_v6 }
  0x40   :  { %1343 = vmatpush1.bf16.msra.mxu0 %v1817_v26  ;;  %374 = vmatprep.mubr.f32.mxu0 %v1695_v0 }
  0x41   :  { %1345 = vmatprep.subr.bf16.mxu0 %v1825_v31 }
  0x42   :  { %1359 = vmatpush1.bf16.msra.mxu1 %v1817_v26 }
  0x43   :  { %1361 = vmatprep.subr.bf16.mxu1 %v1825_v31 }
  0x44   :  { %1347 = vmatpush1.bf16.msra.mxu0 %v1840_v38 }
  0x45   :  { %1349 = vmatprep.subr.bf16.mxu0 %v1843_v40 }
  0x46   :  { %1363 = vmatpush1.bf16.msra.mxu1 %v1840_v38 }
  0x47   :  { %1365 = vmatprep.subr.bf16.mxu1 %v1843_v40 }
  0x48   :  { %1351 = vmatpush1.bf16.msra.mxu0 %v1856_v45 }
  0x49   :  { %1369 = vmatprep.subr.bf16.mxu0 %v1790_v8 }
  0x4a   :  { %1367 = vmatpush1.bf16.msra.mxu1 %v1856_v45 }
  0x4b   :  { %1385 = vmatprep.subr.bf16.mxu1 %v1790_v8 }
  0xa5   :  { %v291_v10 = vpop.permute.xlu0 %290 }
 0x10d   :  { %v170_v53 = vpop.f32.mrb[0].mxu0 }
 0x10e   :  { %v1891_v54 = vadd.f32 %v170_v53, %v1888_v52  ;;  %v172_v55 = vpop.f32.mrb[1].mxu0 }
 0x10f   :  { %v1897_v62 = vadd.f32 %v172_v55, %v1894_v61 }
 0x110   :  { %v269_v56 = vpop.f32.mrb[0].mxu1 }
 0x111   :  { %v274_v58 = vadd.f32 %v269_v56, %v1891_v54  ;;  %v271_v59 = vpop.f32.mrb[1].mxu1 }
 0x112   :  { %v275_v63 = vadd.f32 %v271_v59, %v1897_v62  ;;  %v1904_v20 = vpop.f32.mrb[2].mxu0 }
 0x113   :  { %v1253_v60 = vmul.f32 -1.442695, %v274_v58  ;;  %v1906_v21 = vpop.f32.mrb[3].mxu0 }
 0x114   :  { %v1254_v7 = vmul.f32 -1.442695, %v275_v63 }
 0x115   :  { %1475 = vpow2.f32 %v1253_v60 }
 0x116   :  { %1477 = vtanh.f32 %v275_v63 }
 0x11f   :  { %v1476_v1 = vpop.eup %1475 }
 0x120   :  { %v282_v2 = vadd.f32 1.0, %v1476_v1  ;;  %v1478_v3 = vpop.eup %1477 }
 0x122   :  { %1479 = vrcp.f32 %v282_v2 }
 0x123   :  { %1481 = vpow2.f32 %v1254_v7 }
 0x12c   :  { %v1480_v4 = vpop.eup %1479 }
 0x12d   :  { %v294_v5 = vmul.f32 %v1480_v4, %v1478_v3  ;;  %v1482_v9 = vpop.eup %1481  ;;  %v293_v12 = vmul.f32 %v1480_v4, %v291_v10 }
 0x12e   :  { %v283_v11 = vadd.f32 1.0, %v1482_v9 }
 0x12f   :  { %296 = vrot.lane.b32.xlu0 %v294_v5, %s1696_s16 }
 0x130   :  { %1483 = vrcp.f32 %v283_v11 }
 0x13a   :  { %v1484_v16 = vpop.eup %1483 }
 0x1a1   :  { %v297_v14 = vpop.permute.xlu0 %296 }
 0x1a2   :  { %v299_v15 = vadd.f32 %v297_v14, %v293_v12 }
 0x1a4   :  { %1485 = vtanh.f32 %v299_v15  ;;  %v403_v35 = vrot.slane %v299_v15, 6 }
 0x1ae   :  { %v1486_v17 = vpop.eup %1485 }
 0x1af   :  { %v301_v19 = vmul.f32 %v1486_v17, %v1484_v16 }
 0x1b1   :  { %303 = vrot.lane.b32.xlu1 %v301_v19, %s1696_s16 }
 0x223   :  { %v304_v22 = vpop.permute.xlu1 %303 }
 0x224   :  { %307 = vst.msk [vmem:[#allocation2] sm:$0x3] %vm306_vm3, %v304_v22  ;;  %1255 = vmatmul.mubr.msk.f32.vlgmr.msra.gmra.mrb[4].mxu0 %vm199_vm2, %v304_v22 }
 0x225   :  { %1371 = vmatpush1.bf16.msra.mxu0 %v1798_v13  ;;  %604 = vmatprep.mubr.f32.mxu0 %v1695_v0 }
 0x226   :  { %1373 = vmatprep.subr.bf16.mxu0 %v1807_v18 }
 0x229   :  { %1375 = vmatpush1.bf16.msra.mxu0 %v1817_v26 }
 0x22a   :  { %1377 = vmatprep.subr.bf16.mxu0 %v1825_v31 }
 0x22d   :  { %1379 = vmatpush1.bf16.msra.mxu0 %v1840_v38 }
 0x22e   :  { %1381 = vmatprep.subr.bf16.mxu0 %v1843_v40 }
 0x231   :  { %1383 = vmatpush1.bf16.msra.mxu0 %v1856_v45 }
 0x232   :  { %1401 = vmatprep.subr.bf16.mxu0 %v1790_v8 }
 0x2f7   :  { %v376_v23 = vpop.f32.mrb[4].mxu0 }
 0x2f8   :  { %v383_v24 = vrot.slane %v376_v23, 6  ;;  %v378_v25 = vpop.f32.mrb[5].mxu0 }
 0x2f9   :  { %v384_v29 = vrot.slane %v378_v25, 6 }
 0x2fa   :  { %v387_v27 = vadd.f32 %v383_v24, %v1891_v54 }
 0x2fb   :  { %v388_v30 = vadd.f32 %v384_v29, %v1897_v62 }
 0x2fc   :  { %v1256_v28 = vmul.f32 -1.442695, %v387_v27 }
 0x2fd   :  { %v1257_v41 = vmul.f32 -1.442695, %v388_v30 }
 0x2fe   :  { %1487 = vpow2.f32 %v1256_v28 }
 0x2ff   :  { %1489 = vtanh.f32 %v388_v30 }
 0x308   :  { %v1488_v32 = vpop.eup %1487 }
 0x309   :  { %v395_v33 = vadd.f32 1.0, %v1488_v32  ;;  %v1490_v34 = vpop.eup %1489 }
 0x30b   :  { %1491 = vrcp.f32 %v395_v33 }
 0x30c   :  { %1493 = vpow2.f32 %v1257_v41 }
 0x315   :  { %v1492_v36 = vpop.eup %1491 }
 0x316   :  { %v406_v37 = vmul.f32 %v1492_v36, %v1490_v34  ;;  %v405_v39 = vmul.f32 %v1492_v36, %v403_v35  ;;  %v1494_v42 = vpop.eup %1493 }
 0x317   :  { %v396_v43 = vadd.f32 1.0, %v1494_v42 }
 0x318   :  { %408 = vrot.lane.b32.xlu1 %v406_v37, %s1696_s16 }
 0x319   :  { %1495 = vrcp.f32 %v396_v43 }
 0x323   :  { %v1496_v47 = vpop.eup %1495 }
 0x38a   :  { %v409_v44 = vpop.permute.xlu1 %408 }
 0x38b   :  { %v411_v46 = vadd.f32 %v409_v44, %v405_v39 }
 0x38d   :  { %1497 = vtanh.f32 %v411_v46  ;;  %v518_v3 = vrot.slane %v411_v46, 6 }
 0x397   :  { %v1498_v48 = vpop.eup %1497 }
 0x398   :  { %v1922_v49 = vmul.f32 %v1498_v48, %v1496_v47  ;;  %v1971_v48 = vadd.f32 %v1904_v20, %v1888_v52 }
 0x39a   :  { %v420_v50 = vrot.slane %v1922_v49, 2 }
 0x39c   :  { %421 = vrot.lane.b32.xlu0 %v420_v50, %s1696_s16 }
 0x40e   :  { %v422_v51 = vpop.permute.xlu0 %421 }
 0x40f   :  { %1258 = vmatmul.mubr.msk.f32.vlgmr.msra.gmra.mrb[2].mxu1 %vm199_vm2, %v422_v51 }
 0x410   :  { %1387 = vmatpush1.bf16.msra.mxu1 %v1798_v13  ;;  %719 = vmatprep.mubr.f32.mxu1 %v1695_v0 }
 0x411   :  { %1389 = vmatprep.subr.bf16.mxu1 %v1807_v18 }
 0x414   :  { %1391 = vmatpush1.bf16.msra.mxu1 %v1817_v26 }
 0x415   :  { %1393 = vmatprep.subr.bf16.mxu1 %v1825_v31 }
 0x418   :  { %1395 = vmatpush1.bf16.msra.mxu1 %v1840_v38 }
 0x419   :  { %1397 = vmatprep.subr.bf16.mxu1 %v1843_v40 }
 0x41c   :  { %1399 = vmatpush1.bf16.msra.mxu1 %v1856_v45 }
 0x41d   :  { %1417 = vmatprep.subr.bf16.mxu1 %v1790_v8 }
 0x4e2   :  { %v491_v53 = vpop.f32.mrb[2].mxu1 }
 0x4e3   :  { %v498_v55 = vrot.slane %v491_v53, 4  ;;  %v493_v56 = vpop.f32.mrb[3].mxu1 }
 0x4e4   :  { %v499_v59 = vrot.slane %v493_v56, 4  ;;  %v1976_v56 = vadd.f32 %v1906_v21, %v1894_v61 }
 0x4e5   :  { %v502_v57 = vadd.f32 %v498_v55, %v1891_v54 }
 0x4e6   :  { %v503_v60 = vadd.f32 %v499_v59, %v1897_v62 }
 0x4e7   :  { %v1259_v58 = vmul.f32 -1.442695, %v502_v57 }
 0x4e8   :  { %v1260_v7 = vmul.f32 -1.442695, %v503_v60 }
 0x4e9   :  { %1499 = vpow2.f32 %v1259_v58 }
 0x4ea   :  { %1501 = vtanh.f32 %v503_v60 }
 0x4f3   :  { %v1500_v63 = vpop.eup %1499 }
 0x4f4   :  { %v510_v1 = vadd.f32 1.0, %v1500_v63  ;;  %v1502_v2 = vpop.eup %1501 }
 0x4f6   :  { %1503 = vrcp.f32 %v510_v1 }
 0x4f7   :  { %1505 = vpow2.f32 %v1260_v7 }
 0x500   :  { %v1504_v4 = vpop.eup %1503 }
 0x501   :  { %v521_v5 = vmul.f32 %v1504_v4, %v1502_v2  ;;  %v520_v6 = vmul.f32 %v1504_v4, %v518_v3  ;;  %v1506_v9 = vpop.eup %1505 }
 0x502   :  { %v511_v10 = vadd.f32 1.0, %v1506_v9 }
 0x503   :  { %523 = vrot.lane.b32.xlu1 %v521_v5, %s1696_s16 }
 0x504   :  { %1507 = vrcp.f32 %v511_v10 }
 0x50e   :  { %v1508_v14 = vpop.eup %1507 }
 0x575   :  { %v524_v11 = vpop.permute.xlu1 %523 }
 0x576   :  { %v526_v12 = vadd.f32 %v524_v11, %v520_v6 }
 0x578   :  { %1509 = vtanh.f32 %v526_v12  ;;  %v633_v34 = vrot.slane %v526_v12, 6 }
 0x582   :  { %v1510_v15 = vpop.eup %1509 }
 0x583   :  { %v1939_v16 = vmul.f32 %v1510_v15, %v1508_v14 }
 0x585   :  { %v535_v17 = vrot.slane %v1939_v16, 4 }
 0x587   :  { %536 = vrot.lane.b32.xlu0 %v535_v17, %s1696_s16 }
 0x5f9   :  { %v537_v19 = vpop.permute.xlu0 %536 }
 0x5fa   :  { %1261 = vmatmul.mubr.msk.f32.vlgmr.msra.gmra.mrb[6].mxu0 %vm199_vm2, %v537_v19 }
 0x5fb   :  { %1403 = vmatpush1.bf16.msra.mxu0 %v1798_v13  ;;  %824 = vmatprep.mubr.f32.mxu0 %v1695_v0 }
 0x5fc   :  { %1405 = vmatprep.subr.bf16.mxu0 %v1807_v18 }
 0x5ff   :  { %1407 = vmatpush1.bf16.msra.mxu0 %v1817_v26 }
 0x600   :  { %1409 = vmatprep.subr.bf16.mxu0 %v1825_v31 }
 0x603   :  { %1411 = vmatpush1.bf16.msra.mxu0 %v1840_v38 }
 0x604   :  { %1413 = vmatprep.subr.bf16.mxu0 %v1843_v40 }
 0x607   :  { %1415 = vmatpush1.bf16.msra.mxu0 %v1856_v45 }
 0x608   :  { %1433 = vmatprep.subr.bf16.mxu0 %v1790_v8 }
 0x6cd   :  { %v606_v22 = vpop.f32.mrb[6].mxu0 }
 0x6ce   :  { %v613_v23 = vrot.slane %v606_v22, 2  ;;  %v608_v24 = vpop.f32.mrb[7].mxu0 }
 0x6cf   :  { %v614_v28 = vrot.slane %v608_v24, 2 }
 0x6d0   :  { %v617_v25 = vadd.f32 %v613_v23, %v1891_v54 }
 0x6d1   :  { %v618_v29 = vadd.f32 %v614_v28, %v1897_v62 }
 0x6d2   :  { %v1262_v27 = vmul.f32 -1.442695, %v617_v25 }
 0x6d3   :  { %v1263_v8 = vmul.f32 -1.442695, %v618_v29 }
 0x6d4   :  { %1511 = vpow2.f32 %v1262_v27 }
 0x6d5   :  { %1513 = vtanh.f32 %v618_v29 }
 0x6de   :  { %v1512_v30 = vpop.eup %1511 }
 0x6df   :  { %v625_v32 = vadd.f32 1.0, %v1512_v30  ;;  %v1514_v33 = vpop.eup %1513 }
 0x6e1   :  { %1515 = vrcp.f32 %v625_v32 }
 0x6e2   :  { %1517 = vpow2.f32 %v1263_v8 }
 0x6eb   :  { %v1516_v35 = vpop.eup %1515 }
 0x6ec   :  { %v636_v36 = vmul.f32 %v1516_v35, %v1514_v33  ;;  %v635_v37 = vmul.f32 %v1516_v35, %v633_v34  ;;  %v1518_v39 = vpop.eup %1517 }
 0x6ed   :  { %v626_v54 = vadd.f32 1.0, %v1518_v39 }
 0x6ee   :  { %638 = vrot.lane.b32.xlu1 %v636_v36, %s1696_s16 }
 0x6ef   :  { %1519 = vrcp.f32 %v626_v54 }
 0x6f9   :  { %v1520_v62 = vpop.eup %1519 }
 0x760   :  { %v639_v41 = vpop.permute.xlu1 %638 }
 0x761   :  { %v641_v42 = vadd.f32 %v639_v41, %v635_v37 }
 0x763   :  { %1521 = vtanh.f32 %v641_v42  ;;  %v742_v63 = vrot.slane %v641_v42, 6 }
 0x76d   :  { %v1522_v43 = vpop.eup %1521 }
 0x76e   :  { %v1956_v44 = vmul.f32 %v1522_v43, %v1520_v62 }
 0x770   :  { %v650_v46 = vrot.slane %v1956_v44, 6 }
 0x772   :  { %651 = vrot.lane.b32.xlu0 %v650_v46, %s1696_s16 }
 0x7e4   :  { %v652_v47 = vpop.permute.xlu0 %651 }
 0x7e5   :  { %1264 = vmatmul.mubr.msk.f32.vlgmr.msra.gmra.mrb[4].mxu1 %vm199_vm2, %v652_v47 }
 0x7e6   :  { %1419 = vmatpush1.bf16.msra.mxu1 %v1798_v13  ;;  %938 = vmatprep.mubr.f32.mxu1 %v1695_v0 }
 0x7e7   :  { %1421 = vmatprep.subr.bf16.mxu1 %v1807_v18 }
 0x7ea   :  { %1423 = vmatpush1.bf16.msra.mxu1 %v1817_v26 }
 0x7eb   :  { %1425 = vmatprep.subr.bf16.mxu1 %v1825_v31 }
 0x7ee   :  { %1427 = vmatpush1.bf16.msra.mxu1 %v1840_v38 }
 0x7ef   :  { %1429 = vmatprep.subr.bf16.mxu1 %v1843_v40 }
 0x7f2   :  { %1431 = vmatpush1.bf16.msra.mxu1 %v1856_v45 }
 0x8b8   :  { %v721_v50 = vpop.f32.mrb[4].mxu1 }
 0x8b9   :  { %v726_v51 = vadd.f32 %v721_v50, %v1971_v48  ;;  %v723_v53 = vpop.f32.mrb[5].mxu1 }
 0x8ba   :  { %v727_v57 = vadd.f32 %v723_v53, %v1976_v56 }
 0x8bb   :  { %v1265_v55 = vmul.f32 -1.442695, %v726_v51 }
 0x8bc   :  { %v1266_v2 = vmul.f32 -1.442695, %v727_v57 }
 0x8bd   :  { %1523 = vpow2.f32 %v1265_v55 }
 0x8be   :  { %1525 = vtanh.f32 %v727_v57 }
 0x8c7   :  { %v1524_v58 = vpop.eup %1523 }
 0x8c8   :  { %v734_v59 = vadd.f32 1.0, %v1524_v58  ;;  %v1526_v60 = vpop.eup %1525 }
 0x8ca   :  { %1527 = vrcp.f32 %v734_v59 }
 0x8cb   :  { %1529 = vpow2.f32 %v1266_v2 }
 0x8d4   :  { %v1528_v52 = vpop.eup %1527 }
 0x8d5   :  { %v745_v20 = vmul.f32 %v1528_v52, %v1526_v60  ;;  %v744_v1 = vmul.f32 %v1528_v52, %v742_v63  ;;  %v1530_v3 = vpop.eup %1529 }
 0x8d6   :  { %v735_v4 = vadd.f32 1.0, %v1530_v3 }
 0x8d7   :  { %747 = vrot.lane.b32.xlu1 %v745_v20, %s1696_s16 }
 0x8d8   :  { %1531 = vrcp.f32 %v735_v4 }
 0x8e2   :  { %v1532_v21 = vpop.eup %1531 }
 0x949   :  { %v748_v5 = vpop.permute.xlu1 %747 }
 0x94a   :  { %v750_v61 = vadd.f32 %v748_v5, %v744_v1 }
 0x94c   :  { %1533 = vtanh.f32 %v750_v61 }
 0x956   :  { %v1534_v6 = vpop.eup %1533 }
 0x957   :  { %v752_v7 = vmul.f32 %v1534_v6, %v1532_v21 }
 0x959   :  { %754 = vrot.lane.b32.xlu0 %v752_v7, %s1696_s16 }
 0x9cb   :  { %v755_v9 = vpop.permute.xlu0 %754 }
 0x9cc   :  { %757 = vst.msk [vmem:[#allocation2 + $0x8] sm:$0x3] %vm306_vm3, %v755_v9  ;;  %1267 = vmatmul.mubr.msk.f32.vlgmr.msra.gmra.mrb[8].mxu0 %vm199_vm2, %v755_v9 }
 0x9cd   :  { %1435 = vmatpush1.bf16.msra.mxu0 %v1798_v13  ;;  %1052 = vmatprep.mubr.f32.mxu0 %v1695_v0 }
 0x9ce   :  { %1437 = vmatprep.subr.bf16.mxu0 %v1807_v18 }
 0x9d1   :  { %1439 = vmatpush1.bf16.msra.mxu0 %v1817_v26 }
 0x9d2   :  { %1441 = vmatprep.subr.bf16.mxu0 %v1825_v31 }
 0x9d5   :  { %1443 = vmatpush1.bf16.msra.mxu0 %v1840_v38  ;;  %v853_v38 = vrot.slane %v750_v61, 6 }
 0x9d6   :  { %1445 = vmatprep.subr.bf16.mxu0 %v1843_v40 }
 0x9d9   :  { %1447 = vmatpush1.bf16.msra.mxu0 %v1856_v45 }
 0xa9f   :  { %v826_v10 = vpop.f32.mrb[8].mxu0 }
 0xaa0   :  { %v833_v11 = vrot.slane %v826_v10, 6  ;;  %v828_v12 = vpop.f32.mrb[9].mxu0 }
 0xaa1   :  { %v834_v0 = vrot.slane %v828_v12, 6 }
 0xaa2   :  { %v837_v14 = vadd.f32 %v833_v11, %v1971_v48 }
 0xaa3   :  { %v838_v18 = vadd.f32 %v834_v0, %v1976_v56  ;;  %v1101_v0 = vld [vmem:[%s2102_s6 + $0x10] sm:$0xff] }
 0xaa4   :  { %v1268_v13 = vmul.f32 -1.442695, %v837_v14 }
 0xaa5   :  { %v1269_v45 = vmul.f32 -1.442695, %v838_v18 }
 0xaa6   :  { %1535 = vpow2.f32 %v1268_v13  ;;  %v1100_v13 = vld [vmem:[%s2102_s6 + $0x8] sm:$0xff] }
 0xaa7   :  { %1537 = vtanh.f32 %v838_v18 }
 0xab0   :  { %v1536_v15 = vpop.eup %1535 }
 0xab1   :  { %v845_v26 = vadd.f32 1.0, %v1536_v15  ;;  %v1538_v31 = vpop.eup %1537 }
 0xab3   :  { %1539 = vrcp.f32 %v845_v26 }
 0xab4   :  { %1541 = vpow2.f32 %v1269_v45 }
 0xabd   :  { %v1540_v17 = vpop.eup %1539 }
 0xabe   :  { %v856_v40 = vmul.f32 %v1540_v17, %v1538_v31  ;;  %v855_v19 = vmul.f32 %v1540_v17, %v853_v38  ;;  %v1542_v22 = vpop.eup %1541  ;;  %v1103_v17 = vld [vmem:[%s2102_s6 + $0x20] sm:$0xff] }
 0xabf   :  { %v846_v23 = vadd.f32 1.0, %v1542_v22  ;;  %v1105_v22 = vld [vmem:[%s2102_s6 + $0x30] sm:$0xff] }
 0xac0   :  { %858 = vrot.lane.b32.xlu1 %v856_v40, %s1696_s16  ;;  %v1104_v40 = vld [vmem:[%s2102_s6 + $0x28] sm:$0xff] }
 0xac1   :  { %1543 = vrcp.f32 %v846_v23  ;;  %v1456_v45 = vpack.c.bf16 %v1104_v40, %v1103_v17  ;;  %v1106_v23 = vld [vmem:[%s2102_s6 + $0x38] sm:$0xff] }
 0xacb   :  { %v1544_v27 = vpop.eup %1543 }
 0xb32   :  { %v859_v24 = vpop.permute.xlu1 %858 }
 0xb33   :  { %v861_v25 = vadd.f32 %v859_v24, %v855_v19 }
 0xb35   :  { %1545 = vtanh.f32 %v861_v25  ;;  %v967_v62 = vrot.slane %v861_v25, 6  ;;  %v1460_v25 = vpack.c.bf16 %v1106_v23, %v1105_v22 }
 0xb3f   :  { %v1546_v28 = vpop.eup %1545 }
 0xb40   :  { %v1994_v29 = vmul.f32 %v1546_v28, %v1544_v27 }
 0xb42   :  { %v869_v30 = vrot.slane %v1994_v29, 2 }
 0xb44   :  { %870 = vrot.lane.b32.xlu0 %v869_v30, %s1696_s16 }
 0xbb6   :  { %v871_v32 = vpop.permute.xlu0 %870 }
 0xbb7   :  { %1270 = vmatmul.mubr.msk.f32.vlgmr.msra.gmra.mrb[6].mxu1 %vm199_vm2, %v871_v32 }
 0xc8a   :  { %v940_v33 = vpop.f32.mrb[6].mxu1 }
 0xc8b   :  { %v947_v34 = vrot.slane %v940_v33, 4  ;;  %v942_v35 = vpop.f32.mrb[7].mxu1 }
 0xc8c   :  { %v948_v8 = vrot.slane %v942_v35, 4 }
 0xc8d   :  { %v951_v36 = vadd.f32 %v947_v34, %v1971_v48 }
 0xc8e   :  { %v952_v39 = vadd.f32 %v948_v8, %v1976_v56 }
 0xc8f   :  { %v1271_v37 = vmul.f32 -1.442695, %v951_v36 }
 0xc90   :  { %v1272_v50 = vmul.f32 -1.442695, %v952_v39 }
 0xc91   :  { %1547 = vpow2.f32 %v1271_v37 }
 0xc92   :  { %1549 = vtanh.f32 %v952_v39 }
 0xc9b   :  { %v1548_v54 = vpop.eup %1547 }
 0xc9c   :  { %v959_v41 = vadd.f32 1.0, %v1548_v54  ;;  %v1550_v42 = vpop.eup %1549 }
 0xc9e   :  { %1551 = vrcp.f32 %v959_v41 }
 0xc9f   :  { %1553 = vpow2.f32 %v1272_v50 }
 0xca8   :  { %v1552_v43 = vpop.eup %1551 }
 0xca9   :  { %v970_v46 = vmul.f32 %v1552_v43, %v1550_v42  ;;  %v969_v47 = vmul.f32 %v1552_v43, %v967_v62  ;;  %v1554_v51 = vpop.eup %1553 }
 0xcaa   :  { %v960_v53 = vadd.f32 1.0, %v1554_v51 }
 0xcab   :  { %972 = vrot.lane.b32.xlu1 %v970_v46, %s1696_s16 }
 0xcac   :  { %1555 = vrcp.f32 %v960_v53 }
 0xcb6   :  { %v1556_v58 = vpop.eup %1555 }
 0xd1d   :  { %v973_v55 = vpop.permute.xlu1 %972 }
 0xd1e   :  { %v975_v57 = vadd.f32 %v973_v55, %v969_v47 }
 0xd20   :  { %1557 = vtanh.f32 %v975_v57  ;;  %v1081_v10 = vrot.slane %v975_v57, 6 }
 0xd2a   :  { %v1558_v59 = vpop.eup %1557 }
 0xd2b   :  { %v977_v60 = vmul.f32 %v1558_v59, %v1556_v58 }
 0xd2d   :  { %v983_v63 = vrot.slane %v977_v60, 4 }
 0xd2f   :  { %984 = vrot.lane.b32.xlu0 %v983_v63, %s1696_s16 }
 0xd33   :  { %415 = vrot.lane.b32.xlu0 %v1922_v49, %s1696_s16 }
 0xd37   :  { %645 = vrot.lane.b32.xlu0 %v1956_v44, %s1696_s16 }
 0xd3b   :  { %979 = vrot.lane.b32.xlu0 %v977_v60, %s1696_s16 }
 0xda1   :  { %v985_v52 = vpop.permute.xlu0 %984 }
 0xda2   :  { %1273 = vmatmul.mubr.msk.f32.vlgmr.msra.gmra.mrb[10].mxu0 %vm199_vm2, %v985_v52 }
 0xda5   :  { %v416_v20 = vpop.permute.xlu0 %415 }
 0xda6   :  { %419 = vst.msk [vmem:[#allocation2] sm:$0xc] %vm418_vm4, %v416_v20 }
 0xda9   :  { %v646_v1 = vpop.permute.xlu0 %645 }
 0xdaa   :  { %649 = vst.msk [vmem:[#allocation2] sm:$0xc0] %vm648_vm5, %v646_v1 }
 0xdad   :  { %v980_v2 = vpop.permute.xlu0 %979 }
 0xdae   :  { %982 = vst.msk [vmem:[#allocation2 + $0x8] sm:$0x30] %vm533_vm6, %v980_v2 }
 0xe75   :  { %v1054_v49 = vpop.f32.mrb[10].mxu0 }
 0xe76   :  { %v1061_v3 = vrot.slane %v1054_v49, 2  ;;  %v1056_v44 = vpop.f32.mrb[11].mxu0 }
 0xe77   :  { %v1062_v61 = vrot.slane %v1056_v44, 2 }
 0xe78   :  { %v1065_v4 = vadd.f32 %v1061_v3, %v1971_v48 }
 0xe79   :  { %v1066_v21 = vadd.f32 %v1062_v61, %v1976_v56  ;;  %v1099_v56 = vld [vmem:[%s2102_s6] sm:$0xff] }
 0xe7a   :  { %v1274_v5 = vmul.f32 -1.442695, %v1065_v4  ;;  %v1448_v18 = vpack.c.bf16 %v1100_v13, %v1099_v56 }
 0xe7b   :  { %v1275_v48 = vmul.f32 -1.442695, %v1066_v21 }
 0xe7c   :  { %1559 = vpow2.f32 %v1274_v5  ;;  %1449 = vmatprep.subr.bf16.mxu1 %v1448_v18 }
 0xe7d   :  { %1561 = vtanh.f32 %v1066_v21  ;;  %1451 = vmatpush3.bf16.msra.mxu1 %v1448_v18 }
 0xe86   :  { %v1560_v6 = vpop.eup %1559 }
 0xe87   :  { %v1073_v7 = vadd.f32 1.0, %v1560_v6  ;;  %v1562_v9 = vpop.eup %1561 }
 0xe89   :  { %1563 = vrcp.f32 %v1073_v7 }
 0xe8a   :  { %1565 = vpow2.f32 %v1275_v48 }
 0xe93   :  { %v1564_v11 = vpop.eup %1563 }
 0xe94   :  { %v1084_v12 = vmul.f32 %v1564_v11, %v1562_v9  ;;  %v1083_v14 = vmul.f32 %v1564_v11, %v1081_v10  ;;  %v1566_v26 = vpop.eup %1565 }
 0xe95   :  { %v1074_v31 = vadd.f32 1.0, %v1566_v26 }
 0xe96   :  { %1086 = vrot.lane.b32.xlu1 %v1084_v12, %s1696_s16 }
 0xe97   :  { %1567 = vrcp.f32 %v1074_v31 }
 0xe9a   :  { %530 = vrot.lane.b32.xlu1 %v1939_v16, %s1696_s16  ;;  %v1102_v16 = vld [vmem:[%s2102_s6 + $0x18] sm:$0xff]  ;;  %s1697_s6 = smov [#allocation9]  }
 0xe9b   :  { %v1452_v15 = vpack.c.bf16 %v1102_v16, %v1101_v0  ;;  %s1221_s12 = sshll.u32 %s1697_s6, 4  ;;  %s1222_s12 = int_to_ptr.vmem [resolvable:$true] %s1221_s12 }
 0xe9c   :  { %s1615_s13 = scalar_lea.vmem %s1222_s12, 32  ;;  %p1620_p3 = scmp.lt.s32.totalorder %s1222_s12, %s1222_s12 }
 0xe9d   :  { %1453 = vmatprep.subr.bf16.mxu1 %v1452_v15  ;;  %p1616_p2 = scmp.ne.s32.totalorder %s1222_s12, %s1615_s13  ;;  %p1621_p4 = scmp.lt.s32.totalorder %s1615_s13, %s1615_s13 }
 0xe9e   :  { %865 = vrot.lane.b32.xlu1 %v1994_v29, %s1696_s16  ;;  %1455 = vmatpush3.bf16.msra.mxu1 %v1452_v15 }
 0xe9f   :  { %1457 = vmatprep.subr.bf16.mxu1 %v1456_v45  ;;  %p1622_p5 = por %p1621_p4, %p1620_p3 }
 0xea1   :  { %v1568_v28 = vpop.eup %1567  ;;  %p1623_p6 = pnand %p1622_p5, %p1616_p2 }
 0xea2   :  { %1459 = vmatpush3.bf16.msra.mxu1 %v1456_v45 }
 0xea3   :  { %1461 = vmatprep.subr.bf16.mxu1 %v1460_v25 }
 0xea6   :  { %1463 = vmatpush3.bf16.msra.mxu1 %v1460_v25 }
 0xf08   :  { %v1087_v38 = vpop.permute.xlu1 %1086 }
 0xf09   :  { %v1089_v19 = vadd.f32 %v1087_v38, %v1083_v14 }
 0xf0b   :  { %1569 = vtanh.f32 %v1089_v19  ;;  %1199 = vrot.lane.b32.xlu0 %v1089_v19, %s1696_s16 }
 0xf0c   :  { %v531_v24 = vpop.permute.xlu1 %530 }
 0xf0d   :  { %534 = vst.msk [vmem:[#allocation2] sm:$0x30] %vm533_vm6, %v531_v24 }
 0xf10   :  { %v866_v27 = vpop.permute.xlu1 %865 }
 0xf11   :  { %868 = vst.msk [vmem:[#allocation2 + $0x8] sm:$0xc] %vm418_vm4, %v866_v27 }
 0xf14   :  { %v1097_v29 = vld [vmem:[#allocation2] sm:$0xff] }
 0xf15   :  { %v1570_v30 = vpop.eup %1569  ;;  %1305 = vmatprep.mubr.msk.f32.mxu1 %vm199_vm2, %v1097_v29 }
 0xf16   :  { %v1091_v32 = vmul.f32 %v1570_v30, %v1568_v28 }
 0xf18   :  { %1093 = vrot.lane.b32.xlu1 %v1091_v32, %s1696_s16 }
 0xf7d   :  { %v1200_v33 = vpop.permute.xlu0 %1199 }
 0xf7e   :  { %1202 = vst.msk [vmem:[#allocation11 - $0x6] sm:$0xc0] %vm648_vm5, %v1200_v33 }
 0xf8a   :  { %v1094_v34 = vpop.permute.xlu1 %1093 }
 0xf8b   :  { %1096 = vst.msk [vmem:[#allocation2 + $0x8] sm:$0xc0] %vm648_vm5, %v1094_v34  ;;  %1197 = vst.msk [vmem:[#allocation9 - $0x6] sm:$0xc0] %vm648_vm5, %v1094_v34 }
 0xf92   :  { %v1098_v35 = vld [vmem:[#allocation2 + $0x8] sm:$0xff] }
 0xf93   :  { %1306 = vmatmul.mubr.msk.f32.vlgmr.msra.gmra.mrb[8].mxu1 %vm199_vm2, %v1098_v35 }
 0xf94   :  { %1626 = shalt.err (!%p1623_p6)
}
 0xf95   :  { %s1627_s2 = scalar_lea.hbm %s2105_s9, 32 }
 0xf96   :  { %p1628_p7 = scmp.ne.s32.totalorder %s2105_s9, %s1627_s2  ;;  %p1631_p8 = scmp.lt.u32.totalorder %s1627_s2, %s2105_s9 }
 0xf98   :  { %p1633_p9 = pnand %p1631_p8, %p1628_p7 }
 0xf9a   :  { %1636 = shalt.err (!%p1633_p9)
}
 0xf9b   :  { %1224 = dma.vmem_to_hbm [thread:$0]  %s1222_s12, 32, %s2105_s9, [#allocation10]  }
 0xf9c   :  { %s1698_s18 = smov [#allocation11]  }
 0xf9d   :  { %s1231_s19 = sshll.u32 %s1698_s18, 4  ;;  %s1232_s19 = int_to_ptr.vmem [resolvable:$true] %s1231_s19 }
 0xf9e   :  { %s1637_s20 = scalar_lea.vmem %s1232_s19, 32  ;;  %p1642_p11 = scmp.lt.s32.totalorder %s1232_s19, %s1232_s19 }
 0xf9f   :  { %p1638_p10 = scmp.ne.s32.totalorder %s1232_s19, %s1637_s20  ;;  %p1643_p12 = scmp.lt.s32.totalorder %s1637_s20, %s1637_s20 }
 0xfa1   :  { %p1644_p13 = por %p1643_p12, %p1642_p11 }
 0xfa3   :  { %p1645_p0 = pnand %p1644_p13, %p1638_p10 }
 0xfa5   :  { %1648 = shalt.err (!%p1645_p0)
}
 0xfa6   :  { %s1649_s25 = scalar_lea.hbm %s2106_s10, 32 }
 0xfa7   :  { %p1650_p1 = scmp.ne.s32.totalorder %s2106_s10, %s1649_s25  ;;  %p1653_p2 = scmp.lt.u32.totalorder %s1649_s25, %s2106_s10 }
 0xfa9   :  { %p1655_p3 = pnand %p1653_p2, %p1650_p1 }
 0xfab   :  { %1658 = shalt.err (!%p1655_p3)
}
 0xfac   :  { %1234 = dma.vmem_to_hbm [thread:$0]  %s1232_s19, 32, %s2106_s10, [#allocation10]   ;;  %v1276_v36 = vld [vmem:[%s2103_s7] ss:$0 sm:$0xff] }
 0xfad   :  { %s1699_s6 = smov [#allocation8]  }
 0xfae   :  { %s1208_s12 = sshll.u32 %s1699_s6, 4  ;;  %s1209_s12 = int_to_ptr.vmem [resolvable:$true] %s1208_s12 }
 0xfaf   :  { %s1659_s13 = scalar_lea.vmem %s1209_s12, 256  ;;  %p1664_p5 = scmp.lt.s32.totalorder %s1209_s12, %s1209_s12 }
 0xfb0   :  { %p1660_p4 = scmp.ne.s32.totalorder %s1209_s12, %s1659_s13  ;;  %p1665_p6 = scmp.lt.s32.totalorder %s1659_s13, %s1659_s13 }
 0xfb2   :  { %p1666_p7 = por %p1665_p6, %p1664_p5 }
 0xfb4   :  { %p1667_p8 = pnand %p1666_p7, %p1660_p4 }
0x1066   :  { %v1307_v37 = vpop.f32.mrb[8].mxu1 }
0x1067   :  { %v1192_v8 = vadd.f32 %v1307_v37, %v1276_v36  ;;  %v1186_v39 = vpop.f32.mrb[9].mxu1 }
0x1068   :  { %v1187_v54 = vadd.f32 %v1276_v36, %v1186_v39 }
0x1069   :  { %1196 = vst.msk [vmem:[#allocation8 + $0x8] sm:$0xff] %vm90_vm1, %v1192_v8 }
0x106a   :  { %1195 = vst.msk [vmem:[#allocation8] sm:$0xff] %vm90_vm1, %v1187_v54 }
0x106b   :  { %1670 = shalt.err (!%p1667_p8)
}
0x106c   :  { %s1671_s15 = scalar_lea.hbm %s2104_s8, 256 }
0x106d   :  { %p1672_p9 = scmp.ne.s32.totalorder %s2104_s8, %s1671_s15  ;;  %p1675_p10 = scmp.lt.u32.totalorder %s1671_s15, %s2104_s8 }
0x106f   :  { %p1677_p11 = pnand %p1675_p10, %p1672_p9 }
0x1071   :  { %1680 = shalt.err (!%p1677_p11)
}
0x1072   :  { %1214 = dma.vmem_to_hbm [thread:$0]  %s1209_s12, 256, %s2104_s8, [#allocation5], %s1690_s23, %s1690_s23, %s1691_s24  }
0x1073   :  { %1685 = dma.done.wait [#allocation5], 256  }
0x1074   :  { %1686 = vsyncadd [#allocation5], 4294967040 }
0x1075   :  { %1687 = dma.done.wait [#allocation10], 64  }
0x1076   :  { %1688 = vsyncadd [#allocation10], 4294967232 }
0x1077   :  { %1244 = vsyncpa [#allocation4], 1 }
0x1078   :  { %1245 = vsyncpa [#allocation7], 1 }
0x1079   :  { %1246 = vsyncpa [#allocation5], 1 }
0x107a   :  { %1247 = vsyncpa [#allocation10], 1 }

</bundles_post_ra>
